<compile_context>
chip_gen: v6e
topology: v6e:2x2x1
jax: 0.10.0
libtpu: 0.0.40
codegen_flags: <defaults>
</compile_context>

<pallas_src>
import jax
import jax.numpy as jnp
from jax import lax
from jax.experimental import pallas as pl
from jax.experimental.pallas import tpu as pltpu


# ---------------------------------------------------------------------------
# In-kernel elementwise helpers (VPU/EUP work, f32)
# ---------------------------------------------------------------------------

def _stable_softplus(r):
    # softplus(r) = log(1 + exp(r)), stable for large |r|.
    return jnp.maximum(r, 0.0) + jnp.log1p(jnp.exp(-jnp.abs(r)))


def _stable_log_sigma(r, sp):
    # log(softplus(r)); for very negative r, softplus(r) ~ exp(r) so log ~ r.
    return jnp.where(r < -20.0, r, jnp.log(jnp.maximum(sp, 1e-30)))


# ---------------------------------------------------------------------------
# Kernels
# ---------------------------------------------------------------------------

def _make_bnn_sample_kernel(num_layers, mxu_dtype):
    """'forward' mode: reparameterised sample + full MLP, batch-tiled (grid axis 0)."""
    def kernel(x_ref, *refs):
        p = refs[:6 * num_layers]
        y_ref = refs[6 * num_layers]

        h = x_ref[...]                                    # (TB, D0) f32
        for l in range(num_layers):
            wmu  = p[6 * l + 0][...]                      # (Dout, Din) torch layout
            wrho = p[6 * l + 1][...]
            bmu  = p[6 * l + 2][...]                      # (1, Dout)
            brho = p[6 * l + 3][...]
            ew   = p[6 * l + 4][...]                      # eps_w (Dout, Din)
            eb   = p[6 * l + 5][...]                      # eps_b (1, Dout)

            w = wmu + _stable_softplus(wrho) * ew         # f32 sample
            b = bmu + _stable_softplus(brho) * eb

            # (TB, Din) . (Dout, Din), contracting Din with Din -> (TB, Dout)
            # bf16 MXU inputs, f32 accumulation.
            h = lax.dot_general(h.astype(mxu_dtype), w.astype(mxu_dtype),
                                (((1,), (1,)), ((), ())),
                                preferred_element_type=jnp.float32) + b
        y_ref[...] = h
    return kernel


def _make_bnn_map_kernel(num_layers, mxu_dtype):
    """MAP / deterministic mode: posterior means only (no rho, no eps, no KL)."""
    def kernel(x_ref, *refs):
        p = refs[:2 * num_layers]
        y_ref = refs[2 * num_layers]
        h = x_ref[...]
        for l in range(num_layers):
            wmu = p[2 * l + 0][...]                       # (Dout, Din)
            bmu = p[2 * l + 1][...]                       # (1, Dout)
            h = lax.dot_general(h.astype(mxu_dtype), wmu.astype(mxu_dtype),
                                (((1,), (1,)), ((), ())),
                                preferred_element_type=jnp.float32) + bmu
        y_ref[...] = h
    return kernel


def _make_kl_kernel(num_layers):
    """sum over all params of KL(N(mu, sigma^2) || N(0,1)); batch/eps independent."""
    def kernel(*refs):
        p = refs[:4 * num_layers]
        kl_ref = refs[4 * num_layers]
        tot = jnp.zeros((1, 1), jnp.float32)
        for l in range(num_layers):
            for mu_i, rho_i in ((0, 1), (2, 3)):          # (w_mu, w_rho), (b_mu, b_rho)
                mu = p[4 * l + mu_i][...]
                rho = p[4 * l + rho_i][...]
                sig = _stable_softplus(rho)
                log_sig = _stable_log_sigma(rho, sig)
                kl = -log_sig + 0.5 * (sig * sig + mu * mu) - 0.5
                tot = tot + jnp.sum(kl, keepdims=True)    # (1, 1)
        kl_ref[...] = tot
    return kernel


# ---------------------------------------------------------------------------
# BlockSpec helpers
# ---------------------------------------------------------------------------

def _block_full(shape):
    """Whole-array block; index_map ignores any grid indices (works for any grid)."""
    nd = len(shape)
    return pl.BlockSpec(shape, lambda *_, nd=nd: (0,) * nd)


def _block_batch(shape, tb):
    """Tile axis 0 (batch) over grid axis 0; remaining dims full."""
    tail = tuple(shape[1:])
    return pl.BlockSpec((tb,) + tail, lambda i: (i,) + (0,) * len(tail))


# ---------------------------------------------------------------------------
# Wrapper (mirrors BNN.forward)
# ---------------------------------------------------------------------------

def _canon_params(params):
    out = []
    for (wmu, wrho, bmu, brho) in params:
        out.append((jnp.asarray(wmu, jnp.float32),
                    jnp.asarray(wrho, jnp.float32),
                    jnp.asarray(bmu, jnp.float32).reshape(1, -1),
                    jnp.asarray(brho, jnp.float32).reshape(1, -1)))
    return out


def sample_eps(key, params):
    """Host-side N(0,1) noise, one (eps_w, eps_b) pair per layer."""
    eps = []
    for (wmu, _wrho, bmu, _brho) in params:
        key, kw, kb = jax.random.split(key, 3)
        dout = int(jnp.shape(bmu)[-1])
        eps.append((jax.random.normal(kw, jnp.shape(wmu), jnp.float32),
                    jax.random.normal(kb, (1, dout), jnp.float32)))
    return eps


def bnn_forward(x, params, mode, key=None, eps=None, *,
                batch_tile=None, mxu_dtype=jnp.bfloat16):
    """params: list of (w_mu, w_rho, b_mu, b_rho) in torch.nn.Linear layout
    (w_*: (Dout, Din), b_*: (1, Dout) or (Dout,)).

    mode == 'forward' -> (y, net_kl) with reparameterisation noise.
    otherwise (MAP)   -> y from posterior means only.
    """
    x = jnp.asarray(x, jnp.float32)
    B = x.shape[0]
    params_c = _canon_params(params)
    num_layers = len(params_c)
    d_out = params_c[-1][0].shape[0]

    if batch_tile is None:
        batch_tile = B if B <= 128 else 128
    assert B % batch_tile == 0, "batch must be divisible by batch_tile"
    nb = B // batch_tile

    cparams = pltpu.CompilerParams(
        dimension_semantics=("parallel",),          # megacore on v7x
        vmem_limit_bytes=64 * 1024 * 1024,
    )

    if mode == 'forward':
        if eps is None:
            eps = sample_eps(key if key is not None else jax.random.PRNGKey(0),
                             params_c)

        flat_inputs = [x]
        in_specs = [_block_batch(x.shape, batch_tile)]
        for (wmu, wrho, bmu, brho), (ew, eb) in zip(params_c, eps):
            for arr in (wmu, wrho, bmu, brho,
                        jnp.asarray(ew, jnp.float32),
                        jnp.asarray(eb, jnp.float32).reshape(1, -1)):
                flat_inputs.append(arr)
                in_specs.append(_block_full(arr.shape))

        y = pl.pallas_call(
            _make_bnn_sample_kernel(num_layers, mxu_dtype),
            grid=(nb,),
            out_shape=jax.ShapeDtypeStruct((B, d_out), jnp.float32),
            in_specs=in_specs,
            out_specs=_block_batch((B, d_out), batch_tile),
            compiler_params=cparams,
        )(*flat_inputs)

        # KL is independent of the batch and of eps -> one tiny separate kernel
        # per parameter set (kept off the per-sample forward path).
        kl_inputs, kl_specs = [], []
        for (wmu, wrho, bmu, brho) in params_c:
            for arr in (wmu, wrho, bmu, brho):
                kl_inputs.append(arr)
                kl_specs.append(_block_full(arr.shape))
        kl = pl.pallas_call(
            _make_kl_kernel(num_layers),
            out_shape=jax.ShapeDtypeStruct((1, 1), jnp.float32),
            in_specs=kl_specs,
            out_specs=_block_full((1, 1)),
        )(*kl_inputs)

        return y, kl[0, 0]
    else:
        flat_inputs = [x]
        in_specs = [_block_batch(x.shape, batch_tile)]
        for (wmu, _wrho, bmu, _brho) in params_c:
            for arr in (wmu, bmu):
                flat_inputs.append(arr)
                in_specs.append(_block_full(arr.shape))

        y = pl.pallas_call(
            _make_bnn_map_kernel(num_layers, mxu_dtype),
            grid=(nb,),
            out_shape=jax.ShapeDtypeStruct((B, d_out), jnp.float32),
            in_specs=in_specs,
            out_specs=_block_batch((B, d_out), batch_tile),
            compiler_params=cparams,
        )(*flat_inputs)
        return y


# ---------------------------------------------------------------------------
# Demo / self-check
# ---------------------------------------------------------------------------

if __name__ == "__main__":
    key = jax.random.PRNGKey(0)

    # small BNN: 32 -> 32 -> 16, batch 8
    B, D_in, H, D_out = 8, 32, 32, 16
    layer_dims = [(D_in, H), (H, D_out)]

    params = []
    k = key
    for din, dout in layer_dims:
        k, k1 = jax.random.split(k)
        wmu = jax.random.normal(k1, (dout, din), jnp.float32) * 0.1
        wrho = jnp.full((dout, din), -3.0, jnp.float32)
        bmu = jnp.zeros((1, dout), jnp.float32)
        brho = jnp.full((1, dout), -3.0, jnp.float32)
        params.append((wmu, wrho, bmu, brho))

    k, kx, keps = jax.random.split(k, 3)
    x = jax.random.normal(kx, (B, D_in), jnp.float32)
    eps = sample_eps(keps, params)          # shared with the reference below

    out, net_kl = bnn_forward(x, params, mode='forward', eps=eps)   # stochastic
    out_map = bnn_forward(x, params, mode='MAP')                    # deterministic
    jax.block_until_ready((out, net_kl, out_map))

    # Pure-JAX references.
    def ref_forward(x, params, eps):
        h = x
        for (wmu, wrho, bmu, brho), (ew, eb) in zip(params, eps):
            w = wmu + jnp.log1p(jnp.exp(wrho)) * ew
            b = bmu.reshape(1, -1) + jnp.log1p(jnp.exp(brho.reshape(1, -1))) * eb
            h = h @ w.T + b
        return h

    def ref_kl(params):
        tot = jnp.zeros((), jnp.float32)
        for wmu, wrho, bmu, brho in params:
            for mu, rho in ((wmu, wrho), (bmu, brho)):
                sig = jnp.log1p(jnp.exp(rho))
                tot = tot + jnp.sum(-jnp.log(sig) + 0.5 * (sig * sig + mu * mu) - 0.5)
        return tot

    def ref_map(x, params):
        h = x
        for wmu, _, bmu, _ in params:
            h = h @ wmu.T + bmu.reshape(1, -1)
        return h

    assert out.shape == (B, D_out) and out_map.shape == (B, D_out)
    assert net_kl.shape == ()
    assert bool(jnp.all(jnp.isfinite(out)))
    assert bool(jnp.allclose(net_kl, ref_kl(params), rtol=1e-4, atol=1e-3))
    # bf16 MXU inputs with f32 accumulation -> loose elementwise tolerance
    assert bool(jnp.allclose(out, ref_forward(x, params, eps), rtol=5e-2, atol=5e-2))
    assert bool(jnp.allclose(out_map, ref_map(x, params), rtol=5e-2, atol=5e-2))
    print("KERNEL_OK")
</pallas_src>

<mosaic_0001>
module attributes {stable_mosaic.version = 11 : i64} {
  func.func @kernel(%arg0: i32, %arg1: memref<8x32xf32, #tpu.memory_space<vmem>>, %arg2: memref<32x32xf32, #tpu.memory_space<vmem>>, %arg3: memref<32x32xf32, #tpu.memory_space<vmem>>, %arg4: memref<1x32xf32, #tpu.memory_space<vmem>>, %arg5: memref<1x32xf32, #tpu.memory_space<vmem>>, %arg6: memref<32x32xf32, #tpu.memory_space<vmem>>, %arg7: memref<1x32xf32, #tpu.memory_space<vmem>>, %arg8: memref<16x32xf32, #tpu.memory_space<vmem>>, %arg9: memref<16x32xf32, #tpu.memory_space<vmem>>, %arg10: memref<1x16xf32, #tpu.memory_space<vmem>>, %arg11: memref<1x16xf32, #tpu.memory_space<vmem>>, %arg12: memref<16x32xf32, #tpu.memory_space<vmem>>, %arg13: memref<1x16xf32, #tpu.memory_space<vmem>>, %arg14: memref<8x16xf32, #tpu.memory_space<vmem>>) attributes {dimension_semantics = [#tpu.dimension_semantics<parallel>], iteration_bounds = array<i64: 1>, scalar_prefetch = 0 : i64, scratch_operands = 0 : i64, tpu.core_type = #tpu.core_type<tc>, window_params = [{transform_indices = @transform_0, window_bounds = array<i64: 8, 32>}, {pipeline_mode = #tpu.pipeline_mode<synchronous>, transform_indices = @transform_1, window_bounds = array<i64: 32, 32>}, {pipeline_mode = #tpu.pipeline_mode<synchronous>, transform_indices = @transform_2, window_bounds = array<i64: 32, 32>}, {pipeline_mode = #tpu.pipeline_mode<synchronous>, transform_indices = @transform_3, window_bounds = array<i64: 1, 32>}, {pipeline_mode = #tpu.pipeline_mode<synchronous>, transform_indices = @transform_4, window_bounds = array<i64: 1, 32>}, {pipeline_mode = #tpu.pipeline_mode<synchronous>, transform_indices = @transform_5, window_bounds = array<i64: 32, 32>}, {pipeline_mode = #tpu.pipeline_mode<synchronous>, transform_indices = @transform_6, window_bounds = array<i64: 1, 32>}, {pipeline_mode = #tpu.pipeline_mode<synchronous>, transform_indices = @transform_7, window_bounds = array<i64: 16, 32>}, {pipeline_mode = #tpu.pipeline_mode<synchronous>, transform_indices = @transform_8, window_bounds = array<i64: 16, 32>}, {pipeline_mode = #tpu.pipeline_mode<synchronous>, transform_indices = @transform_9, window_bounds = array<i64: 1, 16>}, {pipeline_mode = #tpu.pipeline_mode<synchronous>, transform_indices = @transform_10, window_bounds = array<i64: 1, 16>}, {pipeline_mode = #tpu.pipeline_mode<synchronous>, transform_indices = @transform_11, window_bounds = array<i64: 16, 32>}, {pipeline_mode = #tpu.pipeline_mode<synchronous>, transform_indices = @transform_12, window_bounds = array<i64: 1, 16>}, {transform_indices = @transform_13, window_bounds = array<i64: 8, 16>}]} {
    %c0 = arith.constant 0 : index
    %c0_0 = arith.constant 0 : index
    %0 = vector.load %arg1[%c0, %c0_0] : memref<8x32xf32, #tpu.memory_space<vmem>>, vector<8x32xf32>
    %c0_1 = arith.constant 0 : index
    %c0_2 = arith.constant 0 : index
    %1 = vector.load %arg2[%c0_1, %c0_2] : memref<32x32xf32, #tpu.memory_space<vmem>>, vector<32x32xf32>
    %c0_3 = arith.constant 0 : index
    %c0_4 = arith.constant 0 : index
    %2 = vector.load %arg3[%c0_3, %c0_4] : memref<32x32xf32, #tpu.memory_space<vmem>>, vector<32x32xf32>
    %c0_5 = arith.constant 0 : index
    %c0_6 = arith.constant 0 : index
    %3 = vector.load %arg4[%c0_5, %c0_6] : memref<1x32xf32, #tpu.memory_space<vmem>>, vector<1x32xf32>
    %c0_7 = arith.constant 0 : index
    %c0_8 = arith.constant 0 : index
    %4 = vector.load %arg5[%c0_7, %c0_8] : memref<1x32xf32, #tpu.memory_space<vmem>>, vector<1x32xf32>
    %c0_9 = arith.constant 0 : index
    %c0_10 = arith.constant 0 : index
    %5 = vector.load %arg6[%c0_9, %c0_10] : memref<32x32xf32, #tpu.memory_space<vmem>>, vector<32x32xf32>
    %c0_11 = arith.constant 0 : index
    %c0_12 = arith.constant 0 : index
    %6 = vector.load %arg7[%c0_11, %c0_12] : memref<1x32xf32, #tpu.memory_space<vmem>>, vector<1x32xf32>
    %cst = arith.constant 0.000000e+00 : f32
    %7 = vector.broadcast %cst : f32 to vector<32x32xf32>
    %8 = arith.maximumf %2, %7 : vector<32x32xf32>
    %9 = math.absf %2 : vector<32x32xf32>
    %cst_13 = arith.constant 0.000000e+00 : f32
    %10 = vector.broadcast %cst_13 : f32 to vector<32x32xf32>
    %11 = arith.subf %10, %9 : vector<32x32xf32>
    %12 = math.exp %11 : vector<32x32xf32>
    %13 = math.log1p %12 : vector<32x32xf32>
    %14 = arith.addf %8, %13 : vector<32x32xf32>
    %15 = arith.mulf %14, %5 : vector<32x32xf32>
    %16 = arith.addf %1, %15 : vector<32x32xf32>
    %cst_14 = arith.constant 0.000000e+00 : f32
    %17 = vector.broadcast %cst_14 : f32 to vector<1x32xf32>
    %18 = arith.maximumf %4, %17 : vector<1x32xf32>
    %19 = math.absf %4 : vector<1x32xf32>
    %cst_15 = arith.constant 0.000000e+00 : f32
    %20 = vector.broadcast %cst_15 : f32 to vector<1x32xf32>
    %21 = arith.subf %20, %19 : vector<1x32xf32>
    %22 = math.exp %21 : vector<1x32xf32>
    %23 = math.log1p %22 : vector<1x32xf32>
    %24 = arith.addf %18, %23 : vector<1x32xf32>
    %25 = arith.mulf %24, %6 : vector<1x32xf32>
    %26 = arith.addf %3, %25 : vector<1x32xf32>
    %27 = arith.truncf %0 : vector<8x32xf32> to vector<8x32xbf16>
    %28 = arith.truncf %16 : vector<32x32xf32> to vector<32x32xbf16>
    %cst_16 = arith.constant dense<0.000000e+00> : vector<8x32xf32>
    %29 = tpu.matmul %27, %28, %cst_16 {dimension_numbers = #tpu.dot_dimension_numbers<[1], [1], [0], [0], [0, 0, 1, 0], [], []>} : vector<8x32xbf16>, vector<32x32xbf16>, vector<8x32xf32> -> vector<8x32xf32>
    %30 = vector.broadcast %26 : vector<1x32xf32> to vector<8x32xf32>
    %31 = arith.addf %29, %30 : vector<8x32xf32>
    %c0_17 = arith.constant 0 : index
    %c0_18 = arith.constant 0 : index
    %32 = vector.load %arg8[%c0_17, %c0_18] : memref<16x32xf32, #tpu.memory_space<vmem>>, vector<16x32xf32>
    %c0_19 = arith.constant 0 : index
    %c0_20 = arith.constant 0 : index
    %33 = vector.load %arg9[%c0_19, %c0_20] : memref<16x32xf32, #tpu.memory_space<vmem>>, vector<16x32xf32>
    %c0_21 = arith.constant 0 : index
    %c0_22 = arith.constant 0 : index
    %34 = vector.load %arg10[%c0_21, %c0_22] : memref<1x16xf32, #tpu.memory_space<vmem>>, vector<1x16xf32>
    %c0_23 = arith.constant 0 : index
    %c0_24 = arith.constant 0 : index
    %35 = vector.load %arg11[%c0_23, %c0_24] : memref<1x16xf32, #tpu.memory_space<vmem>>, vector<1x16xf32>
    %c0_25 = arith.constant 0 : index
    %c0_26 = arith.constant 0 : index
    %36 = vector.load %arg12[%c0_25, %c0_26] : memref<16x32xf32, #tpu.memory_space<vmem>>, vector<16x32xf32>
    %c0_27 = arith.constant 0 : index
    %c0_28 = arith.constant 0 : index
    %37 = vector.load %arg13[%c0_27, %c0_28] : memref<1x16xf32, #tpu.memory_space<vmem>>, vector<1x16xf32>
    %cst_29 = arith.constant 0.000000e+00 : f32
    %38 = vector.broadcast %cst_29 : f32 to vector<16x32xf32>
    %39 = arith.maximumf %33, %38 : vector<16x32xf32>
    %40 = math.absf %33 : vector<16x32xf32>
    %cst_30 = arith.constant 0.000000e+00 : f32
    %41 = vector.broadcast %cst_30 : f32 to vector<16x32xf32>
    %42 = arith.subf %41, %40 : vector<16x32xf32>
    %43 = math.exp %42 : vector<16x32xf32>
    %44 = math.log1p %43 : vector<16x32xf32>
    %45 = arith.addf %39, %44 : vector<16x32xf32>
    %46 = arith.mulf %45, %36 : vector<16x32xf32>
    %47 = arith.addf %32, %46 : vector<16x32xf32>
    %cst_31 = arith.constant 0.000000e+00 : f32
    %48 = vector.broadcast %cst_31 : f32 to vector<1x16xf32>
    %49 = arith.maximumf %35, %48 : vector<1x16xf32>
    %50 = math.absf %35 : vector<1x16xf32>
    %cst_32 = arith.constant 0.000000e+00 : f32
    %51 = vector.broadcast %cst_32 : f32 to vector<1x16xf32>
    %52 = arith.subf %51, %50 : vector<1x16xf32>
    %53 = math.exp %52 : vector<1x16xf32>
    %54 = math.log1p %53 : vector<1x16xf32>
    %55 = arith.addf %49, %54 : vector<1x16xf32>
    %56 = arith.mulf %55, %37 : vector<1x16xf32>
    %57 = arith.addf %34, %56 : vector<1x16xf32>
    %58 = arith.truncf %31 : vector<8x32xf32> to vector<8x32xbf16>
    %59 = arith.truncf %47 : vector<16x32xf32> to vector<16x32xbf16>
    %cst_33 = arith.constant dense<0.000000e+00> : vector<8x16xf32>
    %60 = tpu.matmul %58, %59, %cst_33 {dimension_numbers = #tpu.dot_dimension_numbers<[1], [1], [0], [0], [0, 0, 1, 0], [], []>} : vector<8x32xbf16>, vector<16x32xbf16>, vector<8x16xf32> -> vector<8x16xf32>
    %61 = vector.broadcast %57 : vector<1x16xf32> to vector<8x16xf32>
    %62 = arith.addf %60, %61 : vector<8x16xf32>
    %c0_34 = arith.constant 0 : index
    %c0_35 = arith.constant 0 : index
    %63 = vector.load %arg14[%c0_34, %c0_35] : memref<8x16xf32, #tpu.memory_space<vmem>>, vector<8x16xf32>
    tpu.vector_store %arg14[%c0_34, %c0_35], %62 {strides = array<i32>} : memref<8x16xf32, #tpu.memory_space<vmem>>, vector<8x16xf32>,
    return
  }
  func.func @transform_0(%arg0: i32) -> (i32, i32) {
    %c0_i32 = arith.constant 0 : i32
    %c0_i32_0 = arith.constant 0 : i32
    return %arg0, %c0_i32 : i32, i32
  }
  func.func @transform_1(%arg0: i32) -> (i32, i32) {
    %c0_i32 = arith.constant 0 : i32
    %c0_i32_0 = arith.constant 0 : i32
    %c0_i32_1 = arith.constant 0 : i32
    return %c0_i32, %c0_i32_0 : i32, i32
  }
  func.func @transform_2(%arg0: i32) -> (i32, i32) {
    %c0_i32 = arith.constant 0 : i32
    %c0_i32_0 = arith.constant 0 : i32
    %c0_i32_1 = arith.constant 0 : i32
    return %c0_i32, %c0_i32_0 : i32, i32
  }
  func.func @transform_3(%arg0: i32) -> (i32, i32) {
    %c0_i32 = arith.constant 0 : i32
    %c0_i32_0 = arith.constant 0 : i32
    %c0_i32_1 = arith.constant 0 : i32
    return %c0_i32, %c0_i32_0 : i32, i32
  }
  func.func @transform_4(%arg0: i32) -> (i32, i32) {
    %c0_i32 = arith.constant 0 : i32
    %c0_i32_0 = arith.constant 0 : i32
    %c0_i32_1 = arith.constant 0 : i32
    return %c0_i32, %c0_i32_0 : i32, i32
  }
  func.func @transform_5(%arg0: i32) -> (i32, i32) {
    %c0_i32 = arith.constant 0 : i32
    %c0_i32_0 = arith.constant 0 : i32
    %c0_i32_1 = arith.constant 0 : i32
    return %c0_i32, %c0_i32_0 : i32, i32
  }
  func.func @transform_6(%arg0: i32) -> (i32, i32) {
    %c0_i32 = arith.constant 0 : i32
    %c0_i32_0 = arith.constant 0 : i32
    %c0_i32_1 = arith.constant 0 : i32
    return %c0_i32, %c0_i32_0 : i32, i32
  }
  func.func @transform_7(%arg0: i32) -> (i32, i32) {
    %c0_i32 = arith.constant 0 : i32
    %c0_i32_0 = arith.constant 0 : i32
    %c0_i32_1 = arith.constant 0 : i32
    return %c0_i32, %c0_i32_0 : i32, i32
  }
  func.func @transform_8(%arg0: i32) -> (i32, i32) {
    %c0_i32 = arith.constant 0 : i32
    %c0_i32_0 = arith.constant 0 : i32
    %c0_i32_1 = arith.constant 0 : i32
    return %c0_i32, %c0_i32_0 : i32, i32
  }
  func.func @transform_9(%arg0: i32) -> (i32, i32) {
    %c0_i32 = arith.constant 0 : i32
    %c0_i32_0 = arith.constant 0 : i32
    %c0_i32_1 = arith.constant 0 : i32
    return %c0_i32, %c0_i32_0 : i32, i32
  }
  func.func @transform_10(%arg0: i32) -> (i32, i32) {
    %c0_i32 = arith.constant 0 : i32
    %c0_i32_0 = arith.constant 0 : i32
    %c0_i32_1 = arith.constant 0 : i32
    return %c0_i32, %c0_i32_0 : i32, i32
  }
  func.func @transform_11(%arg0: i32) -> (i32, i32) {
    %c0_i32 = arith.constant 0 : i32
    %c0_i32_0 = arith.constant 0 : i32
    %c0_i32_1 = arith.constant 0 : i32
    return %c0_i32, %c0_i32_0 : i32, i32
  }
  func.func @transform_12(%arg0: i32) -> (i32, i32) {
    %c0_i32 = arith.constant 0 : i32
    %c0_i32_0 = arith.constant 0 : i32
    %c0_i32_1 = arith.constant 0 : i32
    return %c0_i32, %c0_i32_0 : i32, i32
  }
  func.func @transform_13(%arg0: i32) -> (i32, i32) {
    %c0_i32 = arith.constant 0 : i32
    %c0_i32_0 = arith.constant 0 : i32
    return %arg0, %c0_i32 : i32, i32
  }
}

</mosaic_0001>

<bundles_post_ra>
// kernel: tpu_custom_call.1
= control target key start
LH: loop header
LB: loop body
LE: loop exit
PB: predicated region body
PF: predicated region fallthrough
CT: control target
= control target key end

     0   :  { %18 = vsyncpa [#allocation3], 0  ;;  %s884_s0 = inlined_call_operand.hbm [shape: f32[8,32], index: 0, kind: input, shape index: {}]   ;;  %s885_s1 = inlined_call_operand.hbm [shape: f32[32,32], index: 1, kind: input, shape index: {}]   ;;  %s886_s2 = inlined_call_operand.hbm [shape: f32[32,32], index: 2, kind: input, shape index: {}]   ;;  %s887_s3 = inlined_call_operand.vmem [shape: f32[1,32], index: 3, kind: input, shape index: {}]   ;;  %s888_s4 = inlined_call_operand.vmem [shape: f32[1,32], index: 4, kind: input, shape index: {}]   ;;  %s889_s5 = inlined_call_operand.hbm [shape: f32[32,32], index: 5, kind: input, shape index: {}]   ;;  %s890_s6 = inlined_call_operand.vmem [shape: f32[1,32], index: 6, kind: input, shape index: {}]   ;;  %s891_s7 = inlined_call_operand.hbm [shape: f32[16,32], index: 7, kind: input, shape index: {}]   ;;  %s892_s8 = inlined_call_operand.hbm [shape: f32[16,32], index: 8, kind: input, shape index: {}]   ;;  %s893_s9 = inlined_call_operand.vmem [shape: f32[1,16], index: 9, kind: input, shape index: {}]   ;;  %s894_s10 = inlined_call_operand.hbm [shape: f32[1,16], index: 10, kind: input, shape index: {}]   ;;  %s895_s11 = inlined_call_operand.vmem [shape: f32[16,32], index: 11, kind: input, shape index: {}]   ;;  %s896_s12 = inlined_call_operand.vmem [shape: f32[1,16], index: 12, kind: input, shape index: {}]   ;;  %s897_s13 = inlined_call_operand.hbm [shape: f32[8,16], index: 13, kind: output, shape index: {}]  }
   0x1   :  { %19 = vsyncpa [#allocation6], 0 }
   0x2   :  { %20 = vsyncpa [#allocation9], 0 }
   0x3   :  { %21 = vsyncpa [#allocation12], 0 }
   0x4   :  { %22 = vsyncpa [#allocation4], 0  ;;  %s666_s25 = smov [#allocation5]  }
   0x5   :  { %s38_s26 = sshll.u32 %s666_s25, 4  ;;  %s39_s26 = int_to_ptr.vmem [resolvable:$true] %s38_s26 }
   0x6   :  { %s504_s27 = scalar_lea.vmem %s39_s26, 512  ;;  %p509_p1 = scmp.lt.s32.totalorder %s39_s26, %s39_s26 }
   0x7   :  { %p505_p0 = scmp.ne.s32.totalorder %s39_s26, %s504_s27  ;;  %p510_p2 = scmp.lt.s32.totalorder %s504_s27, %s504_s27 }
   0x9   :  { %p511_p3 = por %p510_p2, %p509_p1 }
   0xb   :  { %p512_p4 = pnand %p511_p3, %p505_p0 }
   0xd   :  { %515 = shalt.err (!%p512_p4)
}
   0xe   :  { %s667_s28 = smov 128   ;;  %s668_s29 = smov 8  }
   0xf   :  { %44 = dma.hbm_to_vmem [thread:$0]  %s885_s1, 512, %s39_s26, [#allocation6], %s667_s28, %s667_s28, %s668_s29  }
  0x10   :  { %s669_s15 = smov [#allocation8]   ;;  %s670_s17 = smov [#allocation11]  }
  0x11   :  { %s66_s16 = sshll.u32 %s669_s15, 4  ;;  %s92_s18 = sshll.u32 %s670_s17, 4  ;;  %s67_s16 = int_to_ptr.vmem [resolvable:$true] %s66_s16  ;;  %s93_s18 = int_to_ptr.vmem [resolvable:$true] %s92_s18 }
  0x12   :  { %s524_s19 = scalar_lea.vmem %s67_s16, 512  ;;  %p529_p6 = scmp.lt.s32.totalorder %s67_s16, %s67_s16 }
  0x13   :  { %p525_p5 = scmp.ne.s32.totalorder %s67_s16, %s524_s19  ;;  %p530_p7 = scmp.lt.s32.totalorder %s524_s19, %s524_s19 }
  0x15   :  { %p531_p8 = por %p530_p7, %p529_p6 }
  0x17   :  { %p532_p9 = pnand %p531_p8, %p525_p5 }
  0x19   :  { %535 = shalt.err (!%p532_p9)
}
  0x1a   :  { %72 = dma.hbm_to_vmem [thread:$0]  %s889_s5, 512, %s67_s16, [#allocation9], %s667_s28, %s667_s28, %s668_s29  }
  0x1b   :  { %s544_s1 = scalar_lea.vmem %s93_s18, 256  ;;  %p549_p11 = scmp.lt.s32.totalorder %s93_s18, %s93_s18 }
  0x1c   :  { %p545_p10 = scmp.ne.s32.totalorder %s93_s18, %s544_s1  ;;  %p550_p12 = scmp.lt.s32.totalorder %s544_s1, %s544_s1 }
  0x1e   :  { %p551_p13 = por %p550_p12, %p549_p11 }
  0x20   :  { %p552_p0 = pnand %p551_p13, %p545_p10 }
  0x22   :  { %555 = shalt.err (!%p552_p0)
}
  0x23   :  { %98 = dma.hbm_to_vmem [thread:$0]  %s892_s8, 256, %s93_s18, [#allocation12], %s667_s28, %s667_s28, %s668_s29  }
  0x24   :  { %s671_s24 = smov [#allocation2]   ;;  %s672_s26 = smov [#allocation7]  }
  0x25   :  { %s29_s25 = sshll.u32 %s671_s24, 4  ;;  %s50_s5 = sshll.u32 %s672_s26, 4  ;;  %s30_s25 = int_to_ptr.vmem [resolvable:$true] %s29_s25  ;;  %s51_s5 = int_to_ptr.vmem [resolvable:$true] %s50_s5 }
  0x26   :  { %s564_s27 = scalar_lea.vmem %s30_s25, 128  ;;  %p569_p2 = scmp.lt.s32.totalorder %s30_s25, %s30_s25 }
  0x27   :  { %p565_p1 = scmp.ne.s32.totalorder %s30_s25, %s564_s27  ;;  %p570_p3 = scmp.lt.s32.totalorder %s564_s27, %s564_s27 }
  0x29   :  { %p571_p4 = por %p570_p3, %p569_p2 }
  0x2b   :  { %p572_p5 = pnand %p571_p4, %p565_p1 }
  0x2d   :  { %575 = shalt.err (!%p572_p5)
}
  0x2e   :  { %32 = dma.hbm_to_vmem [thread:$0]  %s884_s0, 128, %s30_s25, [#allocation3]  }
  0x2f   :  { %s584_s15 = scalar_lea.vmem %s51_s5, 512  ;;  %p589_p7 = scmp.lt.s32.totalorder %s51_s5, %s51_s5 }
  0x30   :  { %p585_p6 = scmp.ne.s32.totalorder %s51_s5, %s584_s15  ;;  %p590_p8 = scmp.lt.s32.totalorder %s584_s15, %s584_s15 }
  0x32   :  { %p591_p9 = por %p590_p8, %p589_p7 }
  0x34   :  { %p592_p10 = pnand %p591_p9, %p585_p6 }
  0x36   :  { %595 = shalt.err (!%p592_p10)
}
  0x37   :  { %56 = dma.hbm_to_vmem [thread:$0]  %s886_s2, 512, %s51_s5, [#allocation6], %s667_s28, %s667_s28, %s668_s29  }
  0x38   :  { %s673_s17 = smov [#allocation10]   ;;  %s674_s19 = smov [#allocation13]  }
  0x39   :  { %s80_s18 = sshll.u32 %s673_s17, 4  ;;  %s107_s0 = sshll.u32 %s674_s19, 4  ;;  %s81_s18 = int_to_ptr.vmem [resolvable:$true] %s80_s18  ;;  %s108_s0 = int_to_ptr.vmem [resolvable:$true] %s107_s0 }
  0x3a   :  { %s604_s20 = scalar_lea.vmem %s81_s18, 256  ;;  %p609_p12 = scmp.lt.s32.totalorder %s81_s18, %s81_s18 }
  0x3b   :  { %p605_p11 = scmp.ne.s32.totalorder %s81_s18, %s604_s20  ;;  %p610_p13 = scmp.lt.s32.totalorder %s604_s20, %s604_s20 }
  0x3d   :  { %p611_p0 = por %p610_p13, %p609_p12 }
  0x3f   :  { %p612_p1 = pnand %p611_p0, %p605_p11 }
  0x41   :  { %615 = shalt.err (!%p612_p1)
}
  0x42   :  { %86 = dma.hbm_to_vmem [thread:$0]  %s891_s7, 256, %s81_s18, [#allocation9], %s667_s28, %s667_s28, %s668_s29  }
  0x43   :  { %s624_s2 = scalar_lea.vmem %s108_s0, 16  ;;  %s628_s22 = scalar_lea.vmem %s108_s0, 32 }
  0x44   :  { %p625_p2 = scmp.ne.s32.totalorder %s108_s0, %s624_s2  ;;  %p629_p3 = scmp.lt.s32.totalorder %s108_s0, %s108_s0 }
  0x45   :  { %p630_p4 = scmp.lt.s32.totalorder %s628_s22, %s624_s2 }
  0x47   :  { %p631_p5 = por %p630_p4, %p629_p3 }
  0x49   :  { %p632_p6 = pnand %p631_p5, %p625_p2 }
  0x4b   :  { %635 = shalt.err (!%p632_p6)
}
  0x4c   :  { %110 = dma.hbm_to_vmem [thread:$0]  %s894_s10, 16, %s108_s0, [#allocation12]  }
  0x4d   :  { %656 = dma.done.wait [#allocation3], 128  }
  0x4e   :  { %657 = vsyncadd [#allocation3], 4294967168 }
  0x4f   :  { %658 = dma.done.wait [#allocation6], 1024  }
  0x50   :  { %659 = vsyncadd [#allocation6], 4294966272 }
  0x51   :  { %660 = dma.done.wait [#allocation9], 768  }
  0x52   :  { %661 = vsyncadd [#allocation9], 4294966528 }
  0x53   :  { %662 = dma.done.wait [#allocation12], 272  }
  0x54   :  { %663 = vsyncadd [#allocation12], 4294967024  ;;  %v675_v0 = vmov 0.0   ;;  %vm676_vm0 = vmmov 0   ;;  %v788_v1 = vld [vmem:[#allocation7 + $0x10] sm:$0xff]  ;;  %v790_v2 = vld [vmem:[#allocation7 + $0x18] sm:$0xff] }
  0x55   :  { %438 = vmatprep.subr.bf16.mxu0 %v675_v0  ;;  %442 = vmatprep.mubr.msk.bf16.mxu0 %vm676_vm0, %v675_v0  ;;  %v159_v3 = vand.u32 2147483647, %v788_v1  ;;  %v160_v4 = vand.u32 2147483647, %v790_v2  ;;  %v794_v5 = vld [vmem:[#allocation7] sm:$0xff]  ;;  %v796_v7 = vld [vmem:[#allocation7 + $0x8] sm:$0xff] }
  0x56   :  { %446 = vmatprep.subr.bf16.mxu1 %v675_v0  ;;  %448 = vmatprep.mubr.msk.bf16.mxu1 %vm676_vm0, %v675_v0  ;;  %v157_v9 = vand.u32 2147483647, %v794_v5  ;;  %v158_v10 = vand.u32 2147483647, %v796_v7  ;;  %v800_v15 = vld [vmem:[#allocation11] sm:$0xff]  ;;  %v802_v16 = vld [vmem:[#allocation11 + $0x8] sm:$0xff] }
  0x57   :  { %v163_v6 = vsub.f32 0.0, %v159_v3  ;;  %v164_v8 = vsub.f32 0.0, %v160_v4  ;;  %v308_v17 = vand.u32 2147483647, %v800_v15  ;;  %v309_v20 = vand.u32 2147483647, %v802_v16 }
  0x58   :  { %v161_v13 = vsub.f32 0.0, %v157_v9  ;;  %v162_v14 = vsub.f32 0.0, %v158_v10  ;;  %v155_v46 = vmax.f32 %v788_v1, 0.0  ;;  %v156_v54 = vmax.f32 %v790_v2, 0.0  ;;  %s677_s15 = smov [#allocation14]  }
  0x59   :  { %v169_v11 = vmul.f32 1.442695, %v163_v6  ;;  %v171_v12 = vmul.f32 1.442695, %v164_v8  ;;  %v310_v21 = vsub.f32 0.0, %v308_v17  ;;  %v311_v22 = vsub.f32 0.0, %v309_v20 }
  0x5a   :  { %v165_v18 = vmul.f32 1.442695, %v161_v13  ;;  %v167_v19 = vmul.f32 1.442695, %v162_v14  ;;  %v153_v57 = vmax.f32 %v794_v5, 0.0  ;;  %v154_v61 = vmax.f32 %v796_v7, 0.0 }
  0x5b   :  { %464 = vpow2.f32 %v169_v11  ;;  %v312_v23 = vmul.f32 1.442695, %v310_v21  ;;  %v314_v24 = vmul.f32 1.442695, %v311_v22  ;;  %v150_v6 = vld [vmem:[#allocation8 + $0x10] sm:$0xff]  ;;  %v151_v11 = vld [vmem:[#allocation8 + $0x18] sm:$0xff] }
  0x5c   :  { %466 = vpow2.f32 %v171_v12  ;;  %v306_v21 = vmax.f32 %v800_v15, 0.0  ;;  %vm247_vm7 = vcmask 261120   ;;  %s419_s8 = sshll.u32 %s677_s15, 4  ;;  %vm411_vm10 = vcmask 130048   ;;  %s420_s8 = int_to_ptr.vmem [resolvable:$true] %s419_s8 }
  0x5d   :  { %468 = vpow2.f32 %v165_v18  ;;  %v140_v18 = vld [vmem:[#allocation5 + $0x10] sm:$0xff]  ;;  %s636_s16 = scalar_lea.vmem %s420_s8, 128  ;;  %p641_p8 = scmp.lt.s32.totalorder %s420_s8, %s420_s8 }
  0x5e   :  { %470 = vpow2.f32 %v167_v19  ;;  %p637_p7 = scmp.ne.s32.totalorder %s420_s8, %s636_s16  ;;  %p642_p9 = scmp.lt.s32.totalorder %s636_s16, %s636_s16 }
  0x5f   :  { %472 = vpow2.f32 %v312_v23 }
  0x60   :  { %474 = vpow2.f32 %v314_v24  ;;  %v141_v24 = vld [vmem:[#allocation5 + $0x18] sm:$0xff]  ;;  %p643_p10 = por %p642_p9, %p641_p8 }
  0x62   :  { %p644_p11 = pnand %p643_p10, %p637_p7 }
  0x68   :  { %v465_v25 = vpop.eup %464 }
  0x69   :  { %v467_v26 = vpop.eup %466  ;;  %v191_v27 = vadd.f32 1.0, %v465_v25  ;;  %v194_v35 = vmul.f32 -0.5, %v465_v25  ;;  %v197_v42 = vand.u32 2147483647, %v465_v25 }
  0x6a   :  { %v200_v28 = vadd.f32 1.0, %v467_v26  ;;  %v469_v29 = vpop.eup %468  ;;  %v203_v37 = vmul.f32 -0.5, %v467_v26  ;;  %v206_v44 = vand.u32 2147483647, %v467_v26 }
  0x6b   :  { %476 = vlog2.f32 %v191_v27  ;;  %v471_v30 = vpop.eup %470  ;;  %v173_v31 = vadd.f32 1.0, %v469_v29  ;;  %v176_v39 = vmul.f32 -0.5, %v469_v29  ;;  %v195_v40 = vadd.f32 1.0, %v194_v35 }
  0x6c   :  { %478 = vlog2.f32 %v200_v28  ;;  %v182_v32 = vadd.f32 1.0, %v471_v30  ;;  %v473_v33 = vpop.eup %472  ;;  %v185_v41 = vmul.f32 -0.5, %v471_v30  ;;  %v204_v43 = vadd.f32 1.0, %v203_v37  ;;  %v138_v37 = vld [vmem:[#allocation5] sm:$0xff] }
  0x6d   :  { %480 = vlog2.f32 %v173_v31  ;;  %v806_v34 = vpop.eup %474  ;;  %v316_v36 = vadd.f32 1.0, %v473_v33  ;;  %v319_v45 = vmul.f32 -0.5, %v473_v33  ;;  %v177_v47 = vadd.f32 1.0, %v176_v39  ;;  %v149_v31 = vld [vmem:[#allocation8 + $0x8] sm:$0xff] }
  0x6e   :  { %482 = vlog2.f32 %v182_v32  ;;  %v325_v38 = vadd.f32 1.0, %v806_v34  ;;  %v328_v48 = vmul.f32 -0.5, %v806_v34  ;;  %v196_v49 = vmul.f32 %v465_v25, %v195_v40 }
  0x6f   :  { %484 = vlog2.f32 %v316_v36  ;;  %v179_v50 = vand.u32 2147483647, %v469_v29  ;;  %v186_v51 = vadd.f32 1.0, %v185_v41  ;;  %v188_v52 = vand.u32 2147483647, %v471_v30 }
  0x70   :  { %486 = vlog2.f32 %v325_v38  ;;  %vm812_vm1 = vcmp.lt.f32.partialorder %v197_v42, 0.0004427343  ;;  %v205_v56 = vmul.f32 %v467_v26, %v204_v43  ;;  %vm817_vm2 = vcmp.lt.f32.partialorder %v206_v44, 0.0004427343  ;;  %v148_v26 = vld [vmem:[#allocation8] sm:$0xff]  ;;  %v139_v42 = vld [vmem:[#allocation5 + $0x8] sm:$0xff] }
  0x71   :  { %v320_v62 = vadd.f32 1.0, %v319_v45  ;;  %v178_v1 = vmul.f32 %v469_v29, %v177_v47  ;;  %v322_v3 = vand.u32 2147483647, %v473_v33  ;;  %v329_v2 = vadd.f32 1.0, %v328_v48  ;;  %v303_v43 = vld [vmem:[%s895_s11] sm:$0xff] }
  0x72   :  { %vm824_vm3 = vcmp.lt.f32.partialorder %v179_v50, 0.0004427343  ;;  %v187_v9 = vmul.f32 %v471_v30, %v186_v51  ;;  %vm828_vm4 = vcmp.lt.f32.partialorder %v188_v52, 0.0004427343  ;;  %v331_v17 = vand.u32 2147483647, %v806_v34 }
  0x73   :  { %v321_v22 = vmul.f32 %v473_v33, %v320_v62  ;;  %vm838_vm5 = vcmp.lt.f32.partialorder %v322_v3, 0.0004427343  ;;  %v330_v29 = vmul.f32 %v806_v34, %v329_v2  ;;  %v307_v39 = vmax.f32 %v802_v16, 0.0  ;;  %v304_v50 = vld [vmem:[%s895_s11 + $0x8] sm:$0xff]  ;;  %v147_v2 = vld [vmem:[%s888_s4] sm:$0x1] }
  0x74   :  { %vm846_vm6 = vcmp.lt.f32.partialorder %v331_v17, 0.0004427343 }
  0x78   :  { %v477_v53 = vpop.eup %476 }
  0x79   :  { %v479_v58 = vpop.eup %478  ;;  %v193_v59 = vmul.f32 0.6931472, %v477_v53 }
  0x7a   :  { %v202_v63 = vmul.f32 0.6931472, %v479_v58  ;;  %v481_v4 = vpop.eup %480 }
  0x7b   :  { %v199_v8 = vsel %vm812_vm1, %v196_v49, %v193_v59  ;;  %v483_v7 = vpop.eup %482  ;;  %v175_v14 = vmul.f32 0.6931472, %v481_v4  ;;  %v297_v49 = vld [vmem:[#allocation10] sm:$0xff]  ;;  %v222_v4 = vand.u32 2147483647, %v147_v2 }
  0x7c   :  { %v208_v12 = vsel %vm817_vm2, %v205_v56, %v202_v63  ;;  %v211_v13 = vadd.f32 %v199_v8, %v155_v46  ;;  %v184_v20 = vmul.f32 0.6931472, %v483_v7  ;;  %v485_v23 = vpop.eup %484  ;;  %v298_v56 = vld [vmem:[#allocation10 + $0x8] sm:$0xff] }
  0x7d   :  { %v212_v19 = vadd.f32 %v208_v12, %v156_v54  ;;  %v181_v27 = vsel %vm824_vm3, %v178_v1, %v175_v14  ;;  %v318_v33 = vmul.f32 0.6931472, %v485_v23  ;;  %v487_v35 = vpop.eup %486  ;;  %v137_v1 = vld [vmem:[#allocation2] sm:$0xff]  ;;  %v221_v14 = vmax.f32 %v147_v2, 0.0  ;;  %v146_v23 = vld [vmem:[%s887_s3] sm:$0x1] }
  0x7e   :  { %v215_v25 = vmul.f32 %v211_v13, %v150_v6  ;;  %v190_v32 = vsel %vm828_vm4, %v187_v9, %v184_v20  ;;  %v209_v15 = vadd.f32 %v181_v27, %v153_v57  ;;  %v327_v45 = vmul.f32 0.6931472, %v487_v35  ;;  %v152_v20 = vld [vmem:[%s890_s6] sm:$0x1] }
  0x7f   :  { %v216_v30 = vmul.f32 %v212_v19, %v151_v11  ;;  %v210_v38 = vadd.f32 %v190_v32, %v154_v61  ;;  %v324_v44 = vsel %vm838_vm5, %v321_v22, %v318_v33  ;;  %v238_v3 = vpack.c.bf16 %v137_v1, %v137_v1 }
  0x80   :  { %v219_v36 = vadd.f32 %v215_v25, %v140_v18  ;;  %v213_v34 = vmul.f32 %v209_v15, %v148_v26  ;;  %v334_v47 = vadd.f32 %v324_v44, %v306_v21  ;;  %v333_v51 = vsel %vm846_vm6, %v330_v29, %v327_v45  ;;  %v302_v15 = vld [vmem:[#allocation13] sm:$0x1] }
  0x81   :  { %v220_v41 = vadd.f32 %v216_v30, %v141_v24  ;;  %v214_v46 = vmul.f32 %v210_v38, %v149_v31  ;;  %v335_v53 = vadd.f32 %v333_v51, %v307_v39  ;;  %v223_v6 = vsub.f32 0.0, %v222_v4 }
  0x82   :  { %v217_v16 = vadd.f32 %v213_v34, %v138_v37  ;;  %v336_v54 = vmul.f32 %v334_v47, %v303_v43  ;;  %v242_v19 = vlaneseq  ;;  %v341_v33 = vand.u32 2147483647, %v302_v15  ;;  %v305_v47 = vld [vmem:[%s896_s12] sm:$0x1] }
  0x83   :  { %v240_v48 = vpack.c.bf16 %v220_v41, %v219_v36  ;;  %v218_v52 = vadd.f32 %v214_v46, %v139_v42  ;;  %v337_v57 = vmul.f32 %v335_v53, %v304_v50  ;;  %v340_v44 = vmax.f32 %v302_v15, 0.0 }
  0x84   :  { %v338_v58 = vadd.f32 %v336_v54, %v297_v49  ;;  %v243_v22 = vshrl.u32 %v242_v19, 7  ;;  %v342_v35 = vsub.f32 0.0, %v341_v33 }
  0x85   :  { %v255_v55 = vsel %vm247_vm7, %v240_v48, 0  ;;  %v239_v59 = vpack.c.bf16 %v218_v52, %v217_v16  ;;  %v339_v60 = vadd.f32 %v337_v57, %v298_v56  ;;  %v301_v16 = vld [vmem:[%s893_s9] sm:$0x1] }
  0x86   :  { %439 = vmatpush3.bf16.xpose.msra.mxu0 %v255_v55  ;;  %v244_v25 = vsub.s32 0, %v243_v22  ;;  %v343_v36 = vmul.f32 1.442695, %v342_v35 }
  0x87   :  { %440 = vmatprep.subr.bf16.mxu0 %v675_v0  ;;  %v358_v61 = vpack.c.bf16 %v339_v60, %v338_v58  ;;  %v252_v62 = vsel %vm247_vm7, %v239_v59, 0  ;;  %v224_v0 = vmul.f32 1.442695, %v223_v6 }
  0x89   :  { %v369_v63 = vsel %vm247_vm7, %v358_v61, 0  ;;  %488 = vpow2.f32 %v224_v0 }
  0x8a   :  { %447 = vmatpush3.bf16.xpose.msra.mxu1 %v369_v63 }
  0x8e   :  { %441 = vmatpush3.bf16.xpose.msra.mxu0 %v252_v62 }
  0x95   :  { %443 = vmatmul.mubr.msk.bf16.vlgmr.msra.gmra.mxu0 %vm247_vm7, %v238_v3 }
  0x96   :  { %v489_v8 = vpop.eup %488 }
  0x97   :  { %v226_v5 = vadd.f32 1.0, %v489_v8  ;;  %v229_v9 = vmul.f32 -0.5, %v489_v8  ;;  %v232_v11 = vand.u32 2147483647, %v489_v8 }
  0x99   :  { %490 = vlog2.f32 %v226_v5  ;;  %v230_v10 = vadd.f32 1.0, %v229_v9  ;;  %vm233_vm8 = vcmp.lt.f32.partialorder %v232_v11, 0.0004427343 }
  0x9a   :  { %492 = vpow2.f32 %v343_v36 }
  0x9b   :  { %v231_v13 = vmul.f32 %v489_v8, %v230_v10 }
  0xa6   :  { %v491_v7 = vpop.eup %490 }
  0xa7   :  { %v228_v12 = vmul.f32 0.6931472, %v491_v7  ;;  %v493_v37 = vpop.eup %492 }
  0xa8   :  { %v345_v38 = vadd.f32 1.0, %v493_v37  ;;  %v348_v39 = vmul.f32 -0.5, %v493_v37  ;;  %v351_v42 = vand.u32 2147483647, %v493_v37 }
  0xa9   :  { %v234_v17 = vsel %vm233_vm8, %v231_v13, %v228_v12 }
  0xaa   :  { %v235_v18 = vadd.f32 %v234_v17, %v221_v14  ;;  %494 = vlog2.f32 %v345_v38  ;;  %v349_v40 = vadd.f32 1.0, %v348_v39  ;;  %vm352_vm9 = vcmp.lt.f32.partialorder %v351_v42, 0.0004427343 }
  0xac   :  { %v236_v21 = vmul.f32 %v235_v18, %v152_v20  ;;  %v350_v43 = vmul.f32 %v493_v37, %v349_v40 }
  0xae   :  { %v237_v24 = vadd.f32 %v236_v21, %v146_v23 }
  0xb0   :  { %v245_v26 = vrot.slane %v237_v24, %v244_v25 }
  0xb7   :  { %v495_v41 = vpop.eup %494 }
  0xb8   :  { %v347_v34 = vmul.f32 0.6931472, %v495_v41 }
  0xba   :  { %v353_v45 = vsel %vm352_vm9, %v350_v43, %v347_v34 }
  0xbb   :  { %v354_v46 = vadd.f32 %v353_v45, %v340_v44 }
  0xbd   :  { %v355_v48 = vmul.f32 %v354_v46, %v305_v47 }
  0xbf   :  { %v356_v49 = vadd.f32 %v355_v48, %v301_v16 }
  0xc1   :  { %v363_v50 = vrot.slane %v356_v49, %v244_v25 }
 0x155   :  { %v291_v27 = vpop.f32.mrf.mxu0 }
 0x156   :  { %v292_v28 = vadd.f32 %v291_v27, %v245_v26 }
 0x157   :  { %v444_v29 = vpop.f32.mrf.mxu0 }
 0x158   :  { %v357_v30 = vpack.c.bf16 %v292_v28, %v292_v28 }
 0x159   :  { %v294_v31 = vpop.f32.mrf.mxu0 }
 0x15a   :  { %449 = vmatmul.mubr.msk.bf16.vlgmr.msra.gmra.mxu1 %vm247_vm7, %v357_v30 }
 0x15b   :  { %v445_v32 = vpop.f32.mrf.mxu0 }
 0x21a   :  { %v405_v51 = vpop.f32.mrf.mxu1 }
 0x21b   :  { %v406_v52 = vadd.f32 %v405_v51, %v363_v50 }
 0x21c   :  { %v450_v53 = vpop.f32.mrf.mxu1 }
 0x21d   :  { %412 = vst.msk [vmem:[#allocation14] sm:$0xff] %vm411_vm10, %v406_v52 }
 0x21e   :  { %v408_v54 = vpop.f32.mrf.mxu1 }
 0x21f   :  { %647 = shalt.err (!%p644_p11)
}
 0x220   :  { %422 = dma.vmem_to_hbm [thread:$0]  %s420_s8, 128, %s897_s13, [#allocation4]   ;;  %v451_v55 = vpop.f32.mrf.mxu1 }
 0x221   :  { %664 = dma.done.wait [#allocation4], 128  }
 0x222   :  { %665 = vsyncadd [#allocation4], 4294967168 }
 0x223   :  { %426 = vsyncpa [#allocation3], 1 }
 0x224   :  { %427 = vsyncpa [#allocation6], 1 }
 0x225   :  { %428 = vsyncpa [#allocation9], 1 }
 0x226   :  { %429 = vsyncpa [#allocation12], 1 }
 0x227   :  { %430 = vsyncpa [#allocation4], 1 }

</bundles_post_ra>
